<compile_context>
chip_gen: v7x
topology: tpu7x:2x2x1
jax: 0.10.0
libtpu: 0.0.40
codegen_flags: <defaults>
</compile_context>

<pallas_src>
import functools

import jax
import jax.numpy as jnp
from jax.experimental import pallas as pl
from jax.experimental.pallas import tpu as pltpu

LANES = 128      # lane width of a vreg (last dim)
SUBLANES = 8     # sublane count (second-to-last dim, f32)


def _round_up(x, m):
    return (x + m - 1) // m * m


# ----------------------------------------------------------------------------
# Fused whole-network kernel.
#   x_ref    : (n_pad, P)   zero-padded input activations
#   w_ref    : (L,  P, P)   per-layer zero-padded weights, stored (in, out)
#   b_ref    : (Lb, P)      biases of the norm=False layers only
#   g_ref    : (Ln, P)      BN gamma rows for the norm=True layers
#   beta_ref : (Ln, P)      BN beta  rows for the norm=True layers
#   o_ref    : (n_pad, P)   zero-padded output
# layer_cfg / n_true / n_pad / eps are compile-time constants (closure).
# ----------------------------------------------------------------------------
def _scnet_ae_fused_kernel(x_ref, w_ref, b_ref, g_ref, beta_ref, o_ref, *,
                           layer_cfg, n_true, n_pad, eps):
    need_row_mask = n_pad != n_true
    if need_row_mask:
        row_ids = jax.lax.broadcasted_iota(jnp.int32, (n_pad, 1), 0)
        row_mask = (row_ids < n_true).astype(jnp.float32)

    inv_n = jnp.float32(1.0 / n_true)

    h = x_ref[...]                       # (n_pad, P), one f32 vreg at (8,128)
    ni = 0                               # gamma/beta row index
    bi = 0                               # bias row index
    for li, (norm, act) in enumerate(layer_cfg):
        # MXU matmul; weights pre-transposed to (in, out).
        y = jnp.dot(h, w_ref[li], preferred_element_type=jnp.float32)

        if norm:
            # Keep padded batch rows at exactly 0 so the batch statistics
            # below use the true batch size.
            if need_row_mask:
                y = y * row_mask
            # Training-mode BatchNorm1d: biased stats over the batch axis,
            # folded into one per-feature scale/shift FMA on the wide tensor.
            mean = jnp.sum(y, axis=0, keepdims=True) * inv_n           # (1, P)
            var = jnp.sum(y * y, axis=0, keepdims=True) * inv_n - mean * mean
            var = jnp.maximum(var, 0.0)
            scale = g_ref[pl.ds(ni, 1), :] * jax.lax.rsqrt(var + eps)  # (1, P)
            shift = beta_ref[pl.ds(ni, 1), :] - mean * scale           # (1, P)
            y = y * scale + shift
            ni += 1
        else:
            # Bias only matters when there is no BatchNorm (BN's mean
            # subtraction cancels a per-feature constant exactly).
            y = y + b_ref[pl.ds(bi, 1), :]
            bi += 1

        if act:
            # LeakyReLU(negative_slope=0.2)
            y = jnp.where(y >= 0.0, y, 0.2 * y)

        h = y

    o_ref[...] = h


# ----------------------------------------------------------------------------
# Parameter construction (deterministic, synthetic weights), padded & stacked.
# Encoder: in->d0->d1->d2 (3rd block act=False), bottleneck d2->d2
# Decoder: d2->d1->d0->in (last block norm=False, act=False)
# ----------------------------------------------------------------------------
def init_scnet_ae_params(key, in_dim, out_dim=(64, 48, 32)):
    d0, d1, d2 = out_dim
    layer_dims = [
        # (in, out, norm, act)
        (in_dim, d0, True, True),     # Encoder.down[0]
        (d0, d1, True, True),         # Encoder.down[1]
        (d1, d2, True, False),        # Encoder.down[2]  (act=False)
        (d2, d2, True, True),         # Encoder.bottleneck
        (d2, d1, True, True),         # Decoder.up[0]
        (d1, d0, True, True),         # Decoder.up[1]
        (d0, in_dim, False, False),   # Decoder.up[2]    (norm=False, act=False)
    ]
    P = _round_up(max(in_dim, d0, d1, d2), LANES)
    L = len(layer_dims)

    w = jnp.zeros((L, P, P), jnp.float32)
    b_rows, g_rows, beta_rows, cfg = [], [], [], []
    for li, (fin, fout, norm, act) in enumerate(layer_dims):
        key, kw, kb = jax.random.split(key, 3)
        wi = jax.random.normal(kw, (fin, fout), jnp.float32) * 0.05
        bi = jax.random.normal(kb, (fout,), jnp.float32) * 0.05
        w = w.at[li, :fin, :fout].set(wi)
        if norm:
            # PyTorch BatchNorm1d init: gamma=1, beta=0 (padded lanes -> 0).
            g_rows.append(jnp.zeros((P,), jnp.float32).at[:fout].set(1.0))
            beta_rows.append(jnp.zeros((P,), jnp.float32))
            # Linear bias is mathematically cancelled by BN -> not shipped.
        else:
            b_rows.append(jnp.zeros((P,), jnp.float32).at[:fout].set(bi))
        cfg.append((norm, act))

    return {
        "w": w,
        "b": jnp.stack(b_rows) if b_rows else jnp.zeros((1, P), jnp.float32),
        "gamma": jnp.stack(g_rows) if g_rows else jnp.zeros((1, P), jnp.float32),
        "beta": jnp.stack(beta_rows) if beta_rows else jnp.zeros((1, P), jnp.float32),
        "layer_cfg": tuple(cfg),
        "final_dim": layer_dims[-1][1],
        "pad_dim": P,
    }


# ----------------------------------------------------------------------------
# Forward: one fused pallas_call for the whole autoencoder.
# ----------------------------------------------------------------------------
def scnet_ae_forward(x, params, *, eps=1e-5):
    n, in_dim = x.shape
    P = params["pad_dim"]
    n_pad = _round_up(max(n, SUBLANES), SUBLANES)

    x_pad = jnp.zeros((n_pad, P), jnp.float32).at[:n, :in_dim].set(
        x.astype(jnp.float32))

    kernel = functools.partial(
        _scnet_ae_fused_kernel,
        layer_cfg=params["layer_cfg"], n_true=n, n_pad=n_pad, eps=eps)

    vmem_spec = pl.BlockSpec(memory_space=pltpu.MemorySpace.VMEM)
    out_pad = pl.pallas_call(
        kernel,
        out_shape=jax.ShapeDtypeStruct((n_pad, P), jnp.float32),
        in_specs=[vmem_spec] * 5,
        out_specs=vmem_spec,
    )(x_pad, params["w"], params["b"], params["gamma"], params["beta"])

    return out_pad[:n, :params["final_dim"]]


# ----------------------------------------------------------------------------
# Pure-JAX reference (same math, no Pallas) for a sanity check.
# ----------------------------------------------------------------------------
def scnet_ae_reference(x, params, *, eps=1e-5):
    n, in_dim = x.shape
    P = params["pad_dim"]
    h = jnp.zeros((n, P), jnp.float32).at[:, :in_dim].set(x.astype(jnp.float32))
    ni = bi = 0
    for li, (norm, act) in enumerate(params["layer_cfg"]):
        y = h @ params["w"][li]
        if norm:
            mean = jnp.mean(y, axis=0, keepdims=True)
            var = jnp.mean((y - mean) ** 2, axis=0, keepdims=True)
            y = (y - mean) * jax.lax.rsqrt(var + eps)
            y = y * params["gamma"][ni][None, :] + params["beta"][ni][None, :]
            ni += 1
        else:
            y = y + params["b"][bi][None, :]
            bi += 1
        if act:
            y = jnp.where(y >= 0.0, y, 0.2 * y)
        h = y
    return h[:, :params["final_dim"]]


if __name__ == "__main__":
    key = jax.random.PRNGKey(0)
    in_dim = 32
    out_dim = (64, 48, 32)
    batch = 8  # > 1 so training-mode BatchNorm statistics are well defined

    kx, kp = jax.random.split(key)
    x = jax.random.normal(kx, (batch, in_dim), jnp.float32)
    params = init_scnet_ae_params(kp, in_dim, out_dim)

    y = scnet_ae_forward(x, params)
    y = jax.block_until_ready(y)

    assert y.shape == (batch, in_dim), y.shape
    assert bool(jnp.all(jnp.isfinite(y)))

    y_ref = scnet_ae_reference(x, params)
    max_err = float(jnp.max(jnp.abs(y - y_ref)))
    assert max_err < 2e-2, f"mismatch vs reference: {max_err}"

    print("KERNEL_OK")
</pallas_src>

<mosaic_0001>
module attributes {stable_mosaic.version = 11 : i64} {
  func.func @_scnet_ae_fused_kernel(%arg0: memref<8x128xf32, #tpu.memory_space<vmem>>, %arg1: memref<7x128x128xf32, #tpu.memory_space<vmem>>, %arg2: memref<1x128xf32, #tpu.memory_space<vmem>>, %arg3: memref<6x128xf32, #tpu.memory_space<vmem>>, %arg4: memref<6x128xf32, #tpu.memory_space<vmem>>, %arg5: memref<8x128xf32, #tpu.memory_space<vmem>>) attributes {dimension_semantics = [], scalar_prefetch = 0 : i64, scratch_operands = 0 : i64, tpu.core_type = #tpu.core_type<tc>} {
    %c0 = arith.constant 0 : index
    %c0_0 = arith.constant 0 : index
    %0 = vector.load %arg0[%c0, %c0_0] : memref<8x128xf32, #tpu.memory_space<vmem>>, vector<8x128xf32>
    %c0_1 = arith.constant 0 : index
    %c0_2 = arith.constant 0 : index
    %c0_3 = arith.constant 0 : index
    %1 = vector.load %arg1[%c0_1, %c0_2, %c0_3] : memref<7x128x128xf32, #tpu.memory_space<vmem>>, vector<1x128x128xf32>
    %2 = vector.shape_cast %1 : vector<1x128x128xf32> to vector<128x128xf32>
    %cst = arith.constant dense<0.000000e+00> : vector<8x128xf32>
    %3 = tpu.matmul %0, %2, %cst {dimension_numbers = #tpu.dot_dimension_numbers<[1], [0], [0], [1], [0, 0, 1, 1], [], []>} : vector<8x128xf32>, vector<128x128xf32>, vector<8x128xf32> -> vector<8x128xf32>
    %cst_4 = arith.constant dense<0.000000e+00> : vector<128xf32>
    %4 = vector.multi_reduction <add>, %3, %cst_4 [0] : vector<8x128xf32> to vector<128xf32>
    %5 = vector.shape_cast %4 : vector<128xf32> to vector<1x128xf32>
    %cst_5 = arith.constant 1.250000e-01 : f32
    %6 = vector.broadcast %cst_5 : f32 to vector<1x128xf32>
    %7 = arith.mulf %5, %6 : vector<1x128xf32>
    %8 = arith.mulf %3, %3 : vector<8x128xf32>
    %cst_6 = arith.constant dense<0.000000e+00> : vector<128xf32>
    %9 = vector.multi_reduction <add>, %8, %cst_6 [0] : vector<8x128xf32> to vector<128xf32>
    %10 = vector.shape_cast %9 : vector<128xf32> to vector<1x128xf32>
    %cst_7 = arith.constant 1.250000e-01 : f32
    %11 = vector.broadcast %cst_7 : f32 to vector<1x128xf32>
    %12 = arith.mulf %10, %11 : vector<1x128xf32>
    %13 = arith.mulf %7, %7 : vector<1x128xf32>
    %14 = arith.subf %12, %13 : vector<1x128xf32>
    %cst_8 = arith.constant 0.000000e+00 : f32
    %15 = vector.broadcast %cst_8 : f32 to vector<1x128xf32>
    %16 = arith.maximumf %14, %15 : vector<1x128xf32>
    %c0_9 = arith.constant 0 : index
    %c0_10 = arith.constant 0 : index
    %17 = vector.load %arg3[%c0_9, %c0_10] : memref<6x128xf32, #tpu.memory_space<vmem>>, vector<1x128xf32>
    %cst_11 = arith.constant 9.99999974E-6 : f32
    %18 = vector.broadcast %cst_11 : f32 to vector<1x128xf32>
    %19 = arith.addf %16, %18 : vector<1x128xf32>
    %20 = math.rsqrt %19 : vector<1x128xf32>
    %21 = arith.mulf %17, %20 : vector<1x128xf32>
    %c0_12 = arith.constant 0 : index
    %c0_13 = arith.constant 0 : index
    %22 = vector.load %arg4[%c0_12, %c0_13] : memref<6x128xf32, #tpu.memory_space<vmem>>, vector<1x128xf32>
    %23 = arith.mulf %7, %21 : vector<1x128xf32>
    %24 = arith.subf %22, %23 : vector<1x128xf32>
    %25 = vector.broadcast %21 : vector<1x128xf32> to vector<8x128xf32>
    %26 = arith.mulf %3, %25 : vector<8x128xf32>
    %27 = vector.broadcast %24 : vector<1x128xf32> to vector<8x128xf32>
    %28 = arith.addf %26, %27 : vector<8x128xf32>
    %cst_14 = arith.constant 0.000000e+00 : f32
    %29 = vector.broadcast %cst_14 : f32 to vector<8x128xf32>
    %30 = arith.cmpf oge, %28, %29 : vector<8x128xf32>
    %cst_15 = arith.constant 2.000000e-01 : f32
    %31 = vector.broadcast %cst_15 : f32 to vector<8x128xf32>
    %32 = arith.mulf %31, %28 : vector<8x128xf32>
    %33 = arith.select %30, %28, %32 : vector<8x128xi1>, vector<8x128xf32>
    %c1 = arith.constant 1 : index
    %c0_16 = arith.constant 0 : index
    %c0_17 = arith.constant 0 : index
    %34 = vector.load %arg1[%c1, %c0_16, %c0_17] : memref<7x128x128xf32, #tpu.memory_space<vmem>>, vector<1x128x128xf32>
    %35 = vector.shape_cast %34 : vector<1x128x128xf32> to vector<128x128xf32>
    %cst_18 = arith.constant dense<0.000000e+00> : vector<8x128xf32>
    %36 = tpu.matmul %33, %35, %cst_18 {dimension_numbers = #tpu.dot_dimension_numbers<[1], [0], [0], [1], [0, 0, 1, 1], [], []>} : vector<8x128xf32>, vector<128x128xf32>, vector<8x128xf32> -> vector<8x128xf32>
    %cst_19 = arith.constant dense<0.000000e+00> : vector<128xf32>
    %37 = vector.multi_reduction <add>, %36, %cst_19 [0] : vector<8x128xf32> to vector<128xf32>
    %38 = vector.shape_cast %37 : vector<128xf32> to vector<1x128xf32>
    %cst_20 = arith.constant 1.250000e-01 : f32
    %39 = vector.broadcast %cst_20 : f32 to vector<1x128xf32>
    %40 = arith.mulf %38, %39 : vector<1x128xf32>
    %41 = arith.mulf %36, %36 : vector<8x128xf32>
    %cst_21 = arith.constant dense<0.000000e+00> : vector<128xf32>
    %42 = vector.multi_reduction <add>, %41, %cst_21 [0] : vector<8x128xf32> to vector<128xf32>
    %43 = vector.shape_cast %42 : vector<128xf32> to vector<1x128xf32>
    %cst_22 = arith.constant 1.250000e-01 : f32
    %44 = vector.broadcast %cst_22 : f32 to vector<1x128xf32>
    %45 = arith.mulf %43, %44 : vector<1x128xf32>
    %46 = arith.mulf %40, %40 : vector<1x128xf32>
    %47 = arith.subf %45, %46 : vector<1x128xf32>
    %cst_23 = arith.constant 0.000000e+00 : f32
    %48 = vector.broadcast %cst_23 : f32 to vector<1x128xf32>
    %49 = arith.maximumf %47, %48 : vector<1x128xf32>
    %c1_24 = arith.constant 1 : index
    %c0_25 = arith.constant 0 : index
    %50 = vector.load %arg3[%c1_24, %c0_25] : memref<6x128xf32, #tpu.memory_space<vmem>>, vector<1x128xf32>
    %cst_26 = arith.constant 9.99999974E-6 : f32
    %51 = vector.broadcast %cst_26 : f32 to vector<1x128xf32>
    %52 = arith.addf %49, %51 : vector<1x128xf32>
    %53 = math.rsqrt %52 : vector<1x128xf32>
    %54 = arith.mulf %50, %53 : vector<1x128xf32>
    %c1_27 = arith.constant 1 : index
    %c0_28 = arith.constant 0 : index
    %55 = vector.load %arg4[%c1_27, %c0_28] : memref<6x128xf32, #tpu.memory_space<vmem>>, vector<1x128xf32>
    %56 = arith.mulf %40, %54 : vector<1x128xf32>
    %57 = arith.subf %55, %56 : vector<1x128xf32>
    %58 = vector.broadcast %54 : vector<1x128xf32> to vector<8x128xf32>
    %59 = arith.mulf %36, %58 : vector<8x128xf32>
    %60 = vector.broadcast %57 : vector<1x128xf32> to vector<8x128xf32>
    %61 = arith.addf %59, %60 : vector<8x128xf32>
    %cst_29 = arith.constant 0.000000e+00 : f32
    %62 = vector.broadcast %cst_29 : f32 to vector<8x128xf32>
    %63 = arith.cmpf oge, %61, %62 : vector<8x128xf32>
    %cst_30 = arith.constant 2.000000e-01 : f32
    %64 = vector.broadcast %cst_30 : f32 to vector<8x128xf32>
    %65 = arith.mulf %64, %61 : vector<8x128xf32>
    %66 = arith.select %63, %61, %65 : vector<8x128xi1>, vector<8x128xf32>
    %c2 = arith.constant 2 : index
    %c0_31 = arith.constant 0 : index
    %c0_32 = arith.constant 0 : index
    %67 = vector.load %arg1[%c2, %c0_31, %c0_32] : memref<7x128x128xf32, #tpu.memory_space<vmem>>, vector<1x128x128xf32>
    %68 = vector.shape_cast %67 : vector<1x128x128xf32> to vector<128x128xf32>
    %cst_33 = arith.constant dense<0.000000e+00> : vector<8x128xf32>
    %69 = tpu.matmul %66, %68, %cst_33 {dimension_numbers = #tpu.dot_dimension_numbers<[1], [0], [0], [1], [0, 0, 1, 1], [], []>} : vector<8x128xf32>, vector<128x128xf32>, vector<8x128xf32> -> vector<8x128xf32>
    %cst_34 = arith.constant dense<0.000000e+00> : vector<128xf32>
    %70 = vector.multi_reduction <add>, %69, %cst_34 [0] : vector<8x128xf32> to vector<128xf32>
    %71 = vector.shape_cast %70 : vector<128xf32> to vector<1x128xf32>
    %cst_35 = arith.constant 1.250000e-01 : f32
    %72 = vector.broadcast %cst_35 : f32 to vector<1x128xf32>
    %73 = arith.mulf %71, %72 : vector<1x128xf32>
    %74 = arith.mulf %69, %69 : vector<8x128xf32>
    %cst_36 = arith.constant dense<0.000000e+00> : vector<128xf32>
    %75 = vector.multi_reduction <add>, %74, %cst_36 [0] : vector<8x128xf32> to vector<128xf32>
    %76 = vector.shape_cast %75 : vector<128xf32> to vector<1x128xf32>
    %cst_37 = arith.constant 1.250000e-01 : f32
    %77 = vector.broadcast %cst_37 : f32 to vector<1x128xf32>
    %78 = arith.mulf %76, %77 : vector<1x128xf32>
    %79 = arith.mulf %73, %73 : vector<1x128xf32>
    %80 = arith.subf %78, %79 : vector<1x128xf32>
    %cst_38 = arith.constant 0.000000e+00 : f32
    %81 = vector.broadcast %cst_38 : f32 to vector<1x128xf32>
    %82 = arith.maximumf %80, %81 : vector<1x128xf32>
    %c2_39 = arith.constant 2 : index
    %c0_40 = arith.constant 0 : index
    %83 = vector.load %arg3[%c2_39, %c0_40] : memref<6x128xf32, #tpu.memory_space<vmem>>, vector<1x128xf32>
    %cst_41 = arith.constant 9.99999974E-6 : f32
    %84 = vector.broadcast %cst_41 : f32 to vector<1x128xf32>
    %85 = arith.addf %82, %84 : vector<1x128xf32>
    %86 = math.rsqrt %85 : vector<1x128xf32>
    %87 = arith.mulf %83, %86 : vector<1x128xf32>
    %c2_42 = arith.constant 2 : index
    %c0_43 = arith.constant 0 : index
    %88 = vector.load %arg4[%c2_42, %c0_43] : memref<6x128xf32, #tpu.memory_space<vmem>>, vector<1x128xf32>
    %89 = arith.mulf %73, %87 : vector<1x128xf32>
    %90 = arith.subf %88, %89 : vector<1x128xf32>
    %91 = vector.broadcast %87 : vector<1x128xf32> to vector<8x128xf32>
    %92 = arith.mulf %69, %91 : vector<8x128xf32>
    %93 = vector.broadcast %90 : vector<1x128xf32> to vector<8x128xf32>
    %94 = arith.addf %92, %93 : vector<8x128xf32>
    %c3 = arith.constant 3 : index
    %c0_44 = arith.constant 0 : index
    %c0_45 = arith.constant 0 : index
    %95 = vector.load %arg1[%c3, %c0_44, %c0_45] : memref<7x128x128xf32, #tpu.memory_space<vmem>>, vector<1x128x128xf32>
    %96 = vector.shape_cast %95 : vector<1x128x128xf32> to vector<128x128xf32>
    %cst_46 = arith.constant dense<0.000000e+00> : vector<8x128xf32>
    %97 = tpu.matmul %94, %96, %cst_46 {dimension_numbers = #tpu.dot_dimension_numbers<[1], [0], [0], [1], [0, 0, 1, 1], [], []>} : vector<8x128xf32>, vector<128x128xf32>, vector<8x128xf32> -> vector<8x128xf32>
    %cst_47 = arith.constant dense<0.000000e+00> : vector<128xf32>
    %98 = vector.multi_reduction <add>, %97, %cst_47 [0] : vector<8x128xf32> to vector<128xf32>
    %99 = vector.shape_cast %98 : vector<128xf32> to vector<1x128xf32>
    %cst_48 = arith.constant 1.250000e-01 : f32
    %100 = vector.broadcast %cst_48 : f32 to vector<1x128xf32>
    %101 = arith.mulf %99, %100 : vector<1x128xf32>
    %102 = arith.mulf %97, %97 : vector<8x128xf32>
    %cst_49 = arith.constant dense<0.000000e+00> : vector<128xf32>
    %103 = vector.multi_reduction <add>, %102, %cst_49 [0] : vector<8x128xf32> to vector<128xf32>
    %104 = vector.shape_cast %103 : vector<128xf32> to vector<1x128xf32>
    %cst_50 = arith.constant 1.250000e-01 : f32
    %105 = vector.broadcast %cst_50 : f32 to vector<1x128xf32>
    %106 = arith.mulf %104, %105 : vector<1x128xf32>
    %107 = arith.mulf %101, %101 : vector<1x128xf32>
    %108 = arith.subf %106, %107 : vector<1x128xf32>
    %cst_51 = arith.constant 0.000000e+00 : f32
    %109 = vector.broadcast %cst_51 : f32 to vector<1x128xf32>
    %110 = arith.maximumf %108, %109 : vector<1x128xf32>
    %c3_52 = arith.constant 3 : index
    %c0_53 = arith.constant 0 : index
    %111 = vector.load %arg3[%c3_52, %c0_53] : memref<6x128xf32, #tpu.memory_space<vmem>>, vector<1x128xf32>
    %cst_54 = arith.constant 9.99999974E-6 : f32
    %112 = vector.broadcast %cst_54 : f32 to vector<1x128xf32>
    %113 = arith.addf %110, %112 : vector<1x128xf32>
    %114 = math.rsqrt %113 : vector<1x128xf32>
    %115 = arith.mulf %111, %114 : vector<1x128xf32>
    %c3_55 = arith.constant 3 : index
    %c0_56 = arith.constant 0 : index
    %116 = vector.load %arg4[%c3_55, %c0_56] : memref<6x128xf32, #tpu.memory_space<vmem>>, vector<1x128xf32>
    %117 = arith.mulf %101, %115 : vector<1x128xf32>
    %118 = arith.subf %116, %117 : vector<1x128xf32>
    %119 = vector.broadcast %115 : vector<1x128xf32> to vector<8x128xf32>
    %120 = arith.mulf %97, %119 : vector<8x128xf32>
    %121 = vector.broadcast %118 : vector<1x128xf32> to vector<8x128xf32>
    %122 = arith.addf %120, %121 : vector<8x128xf32>
    %cst_57 = arith.constant 0.000000e+00 : f32
    %123 = vector.broadcast %cst_57 : f32 to vector<8x128xf32>
    %124 = arith.cmpf oge, %122, %123 : vector<8x128xf32>
    %cst_58 = arith.constant 2.000000e-01 : f32
    %125 = vector.broadcast %cst_58 : f32 to vector<8x128xf32>
    %126 = arith.mulf %125, %122 : vector<8x128xf32>
    %127 = arith.select %124, %122, %126 : vector<8x128xi1>, vector<8x128xf32>
    %c4 = arith.constant 4 : index
    %c0_59 = arith.constant 0 : index
    %c0_60 = arith.constant 0 : index
    %128 = vector.load %arg1[%c4, %c0_59, %c0_60] : memref<7x128x128xf32, #tpu.memory_space<vmem>>, vector<1x128x128xf32>
    %129 = vector.shape_cast %128 : vector<1x128x128xf32> to vector<128x128xf32>
    %cst_61 = arith.constant dense<0.000000e+00> : vector<8x128xf32>
    %130 = tpu.matmul %127, %129, %cst_61 {dimension_numbers = #tpu.dot_dimension_numbers<[1], [0], [0], [1], [0, 0, 1, 1], [], []>} : vector<8x128xf32>, vector<128x128xf32>, vector<8x128xf32> -> vector<8x128xf32>
    %cst_62 = arith.constant dense<0.000000e+00> : vector<128xf32>
    %131 = vector.multi_reduction <add>, %130, %cst_62 [0] : vector<8x128xf32> to vector<128xf32>
    %132 = vector.shape_cast %131 : vector<128xf32> to vector<1x128xf32>
    %cst_63 = arith.constant 1.250000e-01 : f32
    %133 = vector.broadcast %cst_63 : f32 to vector<1x128xf32>
    %134 = arith.mulf %132, %133 : vector<1x128xf32>
    %135 = arith.mulf %130, %130 : vector<8x128xf32>
    %cst_64 = arith.constant dense<0.000000e+00> : vector<128xf32>
    %136 = vector.multi_reduction <add>, %135, %cst_64 [0] : vector<8x128xf32> to vector<128xf32>
    %137 = vector.shape_cast %136 : vector<128xf32> to vector<1x128xf32>
    %cst_65 = arith.constant 1.250000e-01 : f32
    %138 = vector.broadcast %cst_65 : f32 to vector<1x128xf32>
    %139 = arith.mulf %137, %138 : vector<1x128xf32>
    %140 = arith.mulf %134, %134 : vector<1x128xf32>
    %141 = arith.subf %139, %140 : vector<1x128xf32>
    %cst_66 = arith.constant 0.000000e+00 : f32
    %142 = vector.broadcast %cst_66 : f32 to vector<1x128xf32>
    %143 = arith.maximumf %141, %142 : vector<1x128xf32>
    %c4_67 = arith.constant 4 : index
    %c0_68 = arith.constant 0 : index
    %144 = vector.load %arg3[%c4_67, %c0_68] : memref<6x128xf32, #tpu.memory_space<vmem>>, vector<1x128xf32>
    %cst_69 = arith.constant 9.99999974E-6 : f32
    %145 = vector.broadcast %cst_69 : f32 to vector<1x128xf32>
    %146 = arith.addf %143, %145 : vector<1x128xf32>
    %147 = math.rsqrt %146 : vector<1x128xf32>
    %148 = arith.mulf %144, %147 : vector<1x128xf32>
    %c4_70 = arith.constant 4 : index
    %c0_71 = arith.constant 0 : index
    %149 = vector.load %arg4[%c4_70, %c0_71] : memref<6x128xf32, #tpu.memory_space<vmem>>, vector<1x128xf32>
    %150 = arith.mulf %134, %148 : vector<1x128xf32>
    %151 = arith.subf %149, %150 : vector<1x128xf32>
    %152 = vector.broadcast %148 : vector<1x128xf32> to vector<8x128xf32>
    %153 = arith.mulf %130, %152 : vector<8x128xf32>
    %154 = vector.broadcast %151 : vector<1x128xf32> to vector<8x128xf32>
    %155 = arith.addf %153, %154 : vector<8x128xf32>
    %cst_72 = arith.constant 0.000000e+00 : f32
    %156 = vector.broadcast %cst_72 : f32 to vector<8x128xf32>
    %157 = arith.cmpf oge, %155, %156 : vector<8x128xf32>
    %cst_73 = arith.constant 2.000000e-01 : f32
    %158 = vector.broadcast %cst_73 : f32 to vector<8x128xf32>
    %159 = arith.mulf %158, %155 : vector<8x128xf32>
    %160 = arith.select %157, %155, %159 : vector<8x128xi1>, vector<8x128xf32>
    %c5 = arith.constant 5 : index
    %c0_74 = arith.constant 0 : index
    %c0_75 = arith.constant 0 : index
    %161 = vector.load %arg1[%c5, %c0_74, %c0_75] : memref<7x128x128xf32, #tpu.memory_space<vmem>>, vector<1x128x128xf32>
    %162 = vector.shape_cast %161 : vector<1x128x128xf32> to vector<128x128xf32>
    %cst_76 = arith.constant dense<0.000000e+00> : vector<8x128xf32>
    %163 = tpu.matmul %160, %162, %cst_76 {dimension_numbers = #tpu.dot_dimension_numbers<[1], [0], [0], [1], [0, 0, 1, 1], [], []>} : vector<8x128xf32>, vector<128x128xf32>, vector<8x128xf32> -> vector<8x128xf32>
    %cst_77 = arith.constant dense<0.000000e+00> : vector<128xf32>
    %164 = vector.multi_reduction <add>, %163, %cst_77 [0] : vector<8x128xf32> to vector<128xf32>
    %165 = vector.shape_cast %164 : vector<128xf32> to vector<1x128xf32>
    %cst_78 = arith.constant 1.250000e-01 : f32
    %166 = vector.broadcast %cst_78 : f32 to vector<1x128xf32>
    %167 = arith.mulf %165, %166 : vector<1x128xf32>
    %168 = arith.mulf %163, %163 : vector<8x128xf32>
    %cst_79 = arith.constant dense<0.000000e+00> : vector<128xf32>
    %169 = vector.multi_reduction <add>, %168, %cst_79 [0] : vector<8x128xf32> to vector<128xf32>
    %170 = vector.shape_cast %169 : vector<128xf32> to vector<1x128xf32>
    %cst_80 = arith.constant 1.250000e-01 : f32
    %171 = vector.broadcast %cst_80 : f32 to vector<1x128xf32>
    %172 = arith.mulf %170, %171 : vector<1x128xf32>
    %173 = arith.mulf %167, %167 : vector<1x128xf32>
    %174 = arith.subf %172, %173 : vector<1x128xf32>
    %cst_81 = arith.constant 0.000000e+00 : f32
    %175 = vector.broadcast %cst_81 : f32 to vector<1x128xf32>
    %176 = arith.maximumf %174, %175 : vector<1x128xf32>
    %c5_82 = arith.constant 5 : index
    %c0_83 = arith.constant 0 : index
    %177 = vector.load %arg3[%c5_82, %c0_83] : memref<6x128xf32, #tpu.memory_space<vmem>>, vector<1x128xf32>
    %cst_84 = arith.constant 9.99999974E-6 : f32
    %178 = vector.broadcast %cst_84 : f32 to vector<1x128xf32>
    %179 = arith.addf %176, %178 : vector<1x128xf32>
    %180 = math.rsqrt %179 : vector<1x128xf32>
    %181 = arith.mulf %177, %180 : vector<1x128xf32>
    %c5_85 = arith.constant 5 : index
    %c0_86 = arith.constant 0 : index
    %182 = vector.load %arg4[%c5_85, %c0_86] : memref<6x128xf32, #tpu.memory_space<vmem>>, vector<1x128xf32>
    %183 = arith.mulf %167, %181 : vector<1x128xf32>
    %184 = arith.subf %182, %183 : vector<1x128xf32>
    %185 = vector.broadcast %181 : vector<1x128xf32> to vector<8x128xf32>
    %186 = arith.mulf %163, %185 : vector<8x128xf32>
    %187 = vector.broadcast %184 : vector<1x128xf32> to vector<8x128xf32>
    %188 = arith.addf %186, %187 : vector<8x128xf32>
    %cst_87 = arith.constant 0.000000e+00 : f32
    %189 = vector.broadcast %cst_87 : f32 to vector<8x128xf32>
    %190 = arith.cmpf oge, %188, %189 : vector<8x128xf32>
    %cst_88 = arith.constant 2.000000e-01 : f32
    %191 = vector.broadcast %cst_88 : f32 to vector<8x128xf32>
    %192 = arith.mulf %191, %188 : vector<8x128xf32>
    %193 = arith.select %190, %188, %192 : vector<8x128xi1>, vector<8x128xf32>
    %c6 = arith.constant 6 : index
    %c0_89 = arith.constant 0 : index
    %c0_90 = arith.constant 0 : index
    %194 = vector.load %arg1[%c6, %c0_89, %c0_90] : memref<7x128x128xf32, #tpu.memory_space<vmem>>, vector<1x128x128xf32>
    %195 = vector.shape_cast %194 : vector<1x128x128xf32> to vector<128x128xf32>
    %cst_91 = arith.constant dense<0.000000e+00> : vector<8x128xf32>
    %196 = tpu.matmul %193, %195, %cst_91 {dimension_numbers = #tpu.dot_dimension_numbers<[1], [0], [0], [1], [0, 0, 1, 1], [], []>} : vector<8x128xf32>, vector<128x128xf32>, vector<8x128xf32> -> vector<8x128xf32>
    %c0_92 = arith.constant 0 : index
    %c0_93 = arith.constant 0 : index
    %197 = vector.load %arg2[%c0_92, %c0_93] : memref<1x128xf32, #tpu.memory_space<vmem>>, vector<1x128xf32>
    %198 = vector.broadcast %197 : vector<1x128xf32> to vector<8x128xf32>
    %199 = arith.addf %196, %198 : vector<8x128xf32>
    %c0_94 = arith.constant 0 : index
    %c0_95 = arith.constant 0 : index
    %200 = vector.load %arg5[%c0_94, %c0_95] : memref<8x128xf32, #tpu.memory_space<vmem>>, vector<8x128xf32>
    tpu.vector_store %arg5[%c0_94, %c0_95], %199 {strides = array<i32>} : memref<8x128xf32, #tpu.memory_space<vmem>>, vector<8x128xf32>,
    return
  }
}

</mosaic_0001>

<bundles_post_ra>
// kernel: tpu_custom_call.1
= control target key start
LH: loop header
LB: loop body
LE: loop exit
PB: predicated region body
PF: predicated region fallthrough
CT: control target
= control target key end

     0   :  { %10 = vsyncpa [#allocation3], 0  ;;  %s1756_s0 = inlined_call_operand.hbm [shape: f32[8,128], index: 0, kind: input, shape index: {}]   ;;  %s1757_s1 = inlined_call_operand.hbm [shape: f32[7,128,128], index: 1, kind: input, shape index: {}]   ;;  %s1758_s2 = inlined_call_operand.vmem [shape: f32[1,128], index: 2, kind: input, shape index: {}]   ;;  %s1759_s3 = inlined_call_operand.vmem [shape: f32[6,128], index: 3, kind: input, shape index: {}]   ;;  %s1760_s4 = inlined_call_operand.hbm [shape: f32[6,128], index: 4, kind: input, shape index: {}]   ;;  %s1761_s5 = inlined_call_operand.hbm [shape: f32[8,128], index: 5, kind: output, shape index: {}]  }
   0x1   :  { %11 = vsyncpa [#allocation6], 0 }
   0x2   :  { %12 = vsyncpa [#allocation4], 0  ;;  %s1564_s18 = smov [#allocation5]   ;;  %s1470_s22 = scalar_lea.hbm %s1757_s1, 14336 }
   0x3   :  { %s28_s19 = sshll.u32 %s1564_s18, 4  ;;  %p1471_p0 = scmp.ne.s32.totalorder %s1757_s1, %s1470_s22  ;;  %s29_s19 = int_to_ptr.vmem [resolvable:$true] %s28_s19 }
   0x4   :  { %p1474_p1 = scmp.lt.u32.totalorder %s1470_s22, %s1757_s1 }
   0x6   :  { %p1476_p2 = pnand %p1474_p1, %p1471_p0 }
   0x8   :  { %1479 = shalt.err (!%p1476_p2)
}
   0x9   :  { %s1480_s27 = scalar_lea.vmem %s29_s19, 14336  ;;  %p1485_p4 = scmp.lt.s32.totalorder %s29_s19, %s29_s19 }
   0xa   :  { %p1481_p3 = scmp.ne.s32.totalorder %s29_s19, %s1480_s27  ;;  %p1486_p5 = scmp.lt.s32.totalorder %s1480_s27, %s1480_s27 }
   0xc   :  { %p1487_p6 = por %p1486_p5, %p1485_p4 }
   0xe   :  { %p1488_p7 = pnand %p1487_p6, %p1481_p3 }
  0x10   :  { %1491 = shalt.err (!%p1488_p7)
}
  0x11   :  { %s1565_s28 = smov 128   ;;  %s1566_s29 = smov 8  }
  0x12   :  { %34 = dma.hbm_to_vmem [thread:$0]  %s1757_s1, 14336, %s29_s19, [#allocation6], %s1565_s28, %s1565_s28, %s1566_s29  }
  0x13   :  { %s1567_s7 = smov [#allocation2]   ;;  %s1568_s9 = smov [#allocation7]  }
  0x14   :  { %s19_s8 = sshll.u32 %s1567_s7, 4  ;;  %s45_s10 = sshll.u32 %s1568_s9, 4  ;;  %s20_s8 = int_to_ptr.vmem [resolvable:$true] %s19_s8  ;;  %s46_s10 = int_to_ptr.vmem [resolvable:$true] %s45_s10 }
  0x15   :  { %s1492_s13 = scalar_lea.hbm %s1756_s0, 128 }
  0x16   :  { %p1493_p8 = scmp.ne.s32.totalorder %s1756_s0, %s1492_s13  ;;  %p1496_p9 = scmp.lt.u32.totalorder %s1492_s13, %s1756_s0 }
  0x18   :  { %p1498_p10 = pnand %p1496_p9, %p1493_p8 }
  0x1a   :  { %1501 = shalt.err (!%p1498_p10)
}
  0x1b   :  { %s1502_s1 = scalar_lea.vmem %s20_s8, 128  ;;  %p1507_p12 = scmp.lt.s32.totalorder %s20_s8, %s20_s8 }
  0x1c   :  { %p1503_p11 = scmp.ne.s32.totalorder %s20_s8, %s1502_s1  ;;  %p1508_p13 = scmp.lt.s32.totalorder %s1502_s1, %s1502_s1 }
  0x1e   :  { %p1509_p0 = por %p1508_p13, %p1507_p12 }
  0x20   :  { %p1510_p1 = pnand %p1509_p0, %p1503_p11 }
  0x22   :  { %1513 = shalt.err (!%p1510_p1)
}
  0x23   :  { %22 = dma.hbm_to_vmem [thread:$0]  %s1756_s0, 128, %s20_s8, [#allocation3]  }
  0x24   :  { %s1514_s22 = scalar_lea.hbm %s1760_s4, 128 }
  0x25   :  { %p1515_p2 = scmp.ne.s32.totalorder %s1760_s4, %s1514_s22  ;;  %p1518_p3 = scmp.lt.u32.totalorder %s1514_s22, %s1760_s4 }
  0x27   :  { %p1520_p4 = pnand %p1518_p3, %p1515_p2 }
  0x29   :  { %1523 = shalt.err (!%p1520_p4)
}
  0x2a   :  { %s1524_s27 = scalar_lea.vmem %s46_s10, 128  ;;  %p1529_p6 = scmp.lt.s32.totalorder %s46_s10, %s46_s10 }
  0x2b   :  { %p1525_p5 = scmp.ne.s32.totalorder %s46_s10, %s1524_s27  ;;  %p1530_p7 = scmp.lt.s32.totalorder %s1524_s27, %s1524_s27 }
  0x2d   :  { %p1531_p8 = por %p1530_p7, %p1529_p6 }
  0x2f   :  { %p1532_p9 = pnand %p1531_p8, %p1525_p5 }
  0x31   :  { %1535 = shalt.err (!%p1532_p9)
}
  0x32   :  { %48 = dma.hbm_to_vmem [thread:$0]  %s1760_s4, 128, %s46_s10, [#allocation6]  }
  0x33   :  { %1558 = dma.done.wait [#allocation3], 128  }
  0x34   :  { %1559 = vsyncadd [#allocation3], 4294967168 }
  0x35   :  { %1560 = dma.done.wait [#allocation6], 14464  }
  0x36   :  { %1561 = vsyncadd [#allocation6], 4294952832  ;;  %v1569_v0 = vmov 0.0|0.0   ;;  %vm1570_vm0 = vmmov 0   ;;  %v1571_v1 = vmov 0.0   ;;  %v59_v2 = vld [vmem:[#allocation5] sm:$0xff] }
  0x37   :  { %1281 = vmatprep.subr.bf16.mxu0 %v1569_v0  ;;  %1068 = vmatprep.mubr.msk.f32.mxu0 %vm1570_vm0, %v1571_v1  ;;  %v60_v3 = vld [vmem:[#allocation5 + $0x8] sm:$0xff]  ;;  %v61_v4 = vld [vmem:[#allocation5 + $0x10] sm:$0xff]  ;;  %v62_v6 = vld [vmem:[#allocation5 + $0x18] sm:$0xff] }
  0x38   :  { %1305 = vmatprep.subr.bf16.mxu1 %v1569_v0  ;;  %1103 = vmatprep.mubr.msk.f32.mxu1 %vm1570_vm0, %v1571_v1  ;;  %v1282_v5 = vpack.c.bf16 %v60_v3, %v59_v2  ;;  %v1285_v7 = vpack.c.bf16 %v62_v6, %v61_v4  ;;  %v63_v8 = vld [vmem:[#allocation5 + $0x20] sm:$0xff]  ;;  %v64_v9 = vld [vmem:[#allocation5 + $0x28] sm:$0xff]  ;;  %v65_v11 = vld [vmem:[#allocation5 + $0x30] sm:$0xff] }
  0x39   :  { %v1288_v10 = vpack.c.bf16 %v64_v9, %v63_v8  ;;  %v66_v12 = vld [vmem:[#allocation5 + $0x38] sm:$0xff]  ;;  %v67_v14 = vld [vmem:[#allocation5 + $0x40] sm:$0xff]  ;;  %v68_v15 = vld [vmem:[#allocation5 + $0x48] sm:$0xff] }
  0x3a   :  { %1283 = vmatpush3.bf16.msra.mxu0 %v1282_v5  ;;  %v1291_v13 = vpack.c.bf16 %v66_v12, %v65_v11  ;;  %v1294_v16 = vpack.c.bf16 %v68_v15, %v67_v14  ;;  %v69_v17 = vld [vmem:[#allocation5 + $0x50] sm:$0xff]  ;;  %v70_v18 = vld [vmem:[#allocation5 + $0x58] sm:$0xff]  ;;  %v71_v20 = vld [vmem:[#allocation5 + $0x60] sm:$0xff] }
  0x3b   :  { %1284 = vmatprep.subr.bf16.mxu0 %v1569_v0  ;;  %v1297_v19 = vpack.c.bf16 %v70_v18, %v69_v17  ;;  %v72_v21 = vld [vmem:[#allocation5 + $0x68] sm:$0xff]  ;;  %v73_v23 = vld [vmem:[#allocation5 + $0x70] sm:$0xff]  ;;  %v74_v24 = vld [vmem:[#allocation5 + $0x78] sm:$0xff] }
  0x3c   :  { %v1300_v22 = vpack.c.bf16 %v72_v21, %v71_v20  ;;  %v1303_v25 = vpack.c.bf16 %v74_v24, %v73_v23  ;;  %v58_v26 = vld [vmem:[#allocation2] sm:$0xff]  ;;  %v184_v27 = vld [vmem:[#allocation5 + $0x80] sm:$0xff]  ;;  %v185_v28 = vld [vmem:[#allocation5 + $0x88] sm:$0xff] }
  0x3d   :  { %v1306_v29 = vpack.c.bf16 %v185_v28, %v184_v27  ;;  %v186_v30 = vld [vmem:[#allocation5 + $0x90] sm:$0xff]  ;;  %v187_v31 = vld [vmem:[#allocation5 + $0x98] sm:$0xff]  ;;  %v188_v33 = vld [vmem:[#allocation5 + $0xa0] sm:$0xff] }
  0x3e   :  { %1286 = vmatpush3.bf16.msra.mxu0 %v1285_v7  ;;  %v1309_v32 = vpack.c.bf16 %v187_v31, %v186_v30  ;;  %v189_v34 = vld [vmem:[#allocation5 + $0xa8] sm:$0xff]  ;;  %v190_v36 = vld [vmem:[#allocation5 + $0xb0] sm:$0xff]  ;;  %v191_v37 = vld [vmem:[#allocation5 + $0xb8] sm:$0xff] }
  0x3f   :  { %1287 = vmatprep.subr.bf16.mxu0 %v1569_v0  ;;  %1307 = vmatpush3.bf16.msra.mxu1 %v1306_v29  ;;  %v1312_v35 = vpack.c.bf16 %v189_v34, %v188_v33  ;;  %v1315_v38 = vpack.c.bf16 %v191_v37, %v190_v36  ;;  %v192_v39 = vld [vmem:[#allocation5 + $0xc0] sm:$0xff]  ;;  %v193_v40 = vld [vmem:[#allocation5 + $0xc8] sm:$0xff]  ;;  %v194_v42 = vld [vmem:[#allocation5 + $0xd0] sm:$0xff] }
  0x40   :  { %1308 = vmatprep.subr.bf16.mxu1 %v1569_v0  ;;  %v1318_v41 = vpack.c.bf16 %v193_v40, %v192_v39  ;;  %v195_v43 = vld [vmem:[#allocation5 + $0xd8] sm:$0xff]  ;;  %v196_v45 = vld [vmem:[#allocation5 + $0xe0] sm:$0xff]  ;;  %v197_v46 = vld [vmem:[#allocation5 + $0xe8] sm:$0xff] }
  0x41   :  { %v1321_v44 = vpack.c.bf16 %v195_v43, %v194_v42  ;;  %v1324_v47 = vpack.c.bf16 %v197_v46, %v196_v45  ;;  %v198_v48 = vld [vmem:[#allocation5 + $0xf0] sm:$0xff]  ;;  %v199_v49 = vld [vmem:[#allocation5 + $0xf8] sm:$0xff]  ;;  %v313_v31 = vld [vmem:[#allocation5 + $0x120] sm:$0xff] }
  0x42   :  { %1289 = vmatpush3.bf16.msra.mxu0 %v1288_v10  ;;  %v1327_v50 = vpack.c.bf16 %v199_v49, %v198_v48  ;;  %v170_v10 = vlaneseq  ;;  %v163_v12 = vld [vmem:[%s1759_s3] sm:$0x1]  ;;  %v311_v28 = vld [vmem:[#allocation5 + $0x110] sm:$0xff]  ;;  %v317_v37 = vld [vmem:[#allocation5 + $0x140] sm:$0xff] }
  0x43   :  { %1290 = vmatprep.subr.bf16.mxu0 %v1569_v0  ;;  %1310 = vmatpush3.bf16.msra.mxu1 %v1309_v32  ;;  %v312_v29 = vld [vmem:[#allocation5 + $0x118] sm:$0xff]  ;;  %v314_v32 = vld [vmem:[#allocation5 + $0x128] sm:$0xff]  ;;  %v315_v34 = vld [vmem:[#allocation5 + $0x130] sm:$0xff] }
  0x44   :  { %1311 = vmatprep.subr.bf16.mxu1 %v1569_v0  ;;  %v171_v11 = vshrl.u32 %v170_v10, 7  ;;  %v1333_v30 = vpack.c.bf16 %v312_v29, %v311_v28  ;;  %v1336_v33 = vpack.c.bf16 %v314_v32, %v313_v31  ;;  %v319_v40 = vld [vmem:[#allocation5 + $0x150] sm:$0xff]  ;;  %v321_v43 = vld [vmem:[#allocation5 + $0x160] sm:$0xff]  ;;  %v436_v28 = vld [vmem:[#allocation5 + $0x1a8] sm:$0xff] }
  0x45   :  { %v323_v46 = vld [vmem:[#allocation5 + $0x170] sm:$0xff]  ;;  %v438_v31 = vld [vmem:[#allocation5 + $0x1b8] sm:$0xff] }
  0x46   :  { %1292 = vmatpush3.bf16.msra.mxu0 %v1291_v13  ;;  %v1666_v13 = vsub.s32 0, %v171_v11  ;;  %v292_v11 = vld [vmem:[#allocation7 + $0x1] sm:$0x1] }
  0x47   :  { %1293 = vmatprep.subr.bf16.mxu0 %v1569_v0  ;;  %1313 = vmatpush3.bf16.msra.mxu1 %v1312_v35  ;;  %v316_v35 = vld [vmem:[#allocation5 + $0x138] sm:$0xff] }
  0x48   :  { %1314 = vmatprep.subr.bf16.mxu1 %v1569_v0  ;;  %v1339_v36 = vpack.c.bf16 %v316_v35, %v315_v34  ;;  %v440_v34 = vld [vmem:[#allocation5 + $0x1c8] sm:$0xff] }
  0x4a   :  { %1295 = vmatpush3.bf16.msra.mxu0 %v1294_v16  ;;  %v167_v16 = vld [vmem:[#allocation7] sm:$0x1] }
  0x4b   :  { %1296 = vmatprep.subr.bf16.mxu0 %v1569_v0  ;;  %1316 = vmatpush3.bf16.msra.mxu1 %v1315_v38  ;;  %v318_v38 = vld [vmem:[#allocation5 + $0x148] sm:$0xff] }
  0x4c   :  { %1317 = vmatprep.subr.bf16.mxu1 %v1569_v0  ;;  %v1342_v39 = vpack.c.bf16 %v318_v38, %v317_v37  ;;  %v442_v37 = vld [vmem:[#allocation5 + $0x1d8] sm:$0xff] }
  0x4e   :  { %1298 = vmatpush3.bf16.msra.mxu0 %v1297_v19 }
  0x4f   :  { %1299 = vmatprep.subr.bf16.mxu0 %v1569_v0  ;;  %1319 = vmatpush3.bf16.msra.mxu1 %v1318_v41  ;;  %v320_v41 = vld [vmem:[#allocation5 + $0x158] sm:$0xff] }
  0x50   :  { %1320 = vmatprep.subr.bf16.mxu1 %v1569_v0  ;;  %v1345_v42 = vpack.c.bf16 %v320_v41, %v319_v40  ;;  %v444_v40 = vld [vmem:[#allocation5 + $0x1e8] sm:$0xff] }
  0x52   :  { %1301 = vmatpush3.bf16.msra.mxu0 %v1300_v22 }
  0x53   :  { %1302 = vmatprep.subr.bf16.mxu0 %v1569_v0  ;;  %1322 = vmatpush3.bf16.msra.mxu1 %v1321_v44  ;;  %v322_v44 = vld [vmem:[#allocation5 + $0x168] sm:$0xff] }
  0x54   :  { %1323 = vmatprep.subr.bf16.mxu1 %v1569_v0  ;;  %v1348_v45 = vpack.c.bf16 %v322_v44, %v321_v43  ;;  %v446_v43 = vld [vmem:[#allocation5 + $0x1f8] sm:$0xff] }
  0x56   :  { %1304 = vmatpush3.bf16.msra.mxu0 %v1303_v25  ;;  %v309_v25 = vld [vmem:[#allocation5 + $0x100] sm:$0xff] }
  0x57   :  { %1329 = vmatprep.subr.bf16.mxu0 %v1569_v0  ;;  %1325 = vmatpush3.bf16.msra.mxu1 %v1324_v47  ;;  %v324_v47 = vld [vmem:[#allocation5 + $0x178] sm:$0xff] }
  0x58   :  { %1326 = vmatprep.subr.bf16.mxu1 %v1569_v0  ;;  %v1351_v48 = vpack.c.bf16 %v324_v47, %v323_v46 }
  0x59   :  { %1069 = vmatmul.mubr.f32.vlgmr.msra.gmra.mrb[0].mxu0 %v58_v26  ;;  %v310_v26 = vld [vmem:[#allocation5 + $0x108] sm:$0xff] }
  0x5a   :  { %1138 = vmatprep.mubr.msk.f32.mxu0 %vm1570_vm0, %v1571_v1  ;;  %v1330_v27 = vpack.c.bf16 %v310_v26, %v309_v25  ;;  %v434_v25 = vld [vmem:[#allocation5 + $0x198] sm:$0xff] }
  0x5b   :  { %1328 = vmatpush3.bf16.msra.mxu1 %v1327_v50 }
  0x5c   :  { %1353 = vmatprep.subr.bf16.mxu1 %v1569_v0  ;;  %1331 = vmatpush3.bf16.msra.mxu0 %v1330_v27  ;;  %v435_v27 = vld [vmem:[#allocation5 + $0x1a0] sm:$0xff] }
  0x5d   :  { %1332 = vmatprep.subr.bf16.mxu0 %v1569_v0  ;;  %v1360_v29 = vpack.c.bf16 %v436_v28, %v435_v27  ;;  %v564_v27 = vld [vmem:[#allocation5 + $0x240] sm:$0xff]  ;;  %v565_v28 = vld [vmem:[#allocation5 + $0x248] sm:$0xff] }
  0x60   :  { %1334 = vmatpush3.bf16.msra.mxu0 %v1333_v30  ;;  %v437_v30 = vld [vmem:[#allocation5 + $0x1b0] sm:$0xff] }
  0x61   :  { %1335 = vmatprep.subr.bf16.mxu0 %v1569_v0  ;;  %v1363_v32 = vpack.c.bf16 %v438_v31, %v437_v30  ;;  %v566_v30 = vld [vmem:[#allocation5 + $0x250] sm:$0xff]  ;;  %v567_v31 = vld [vmem:[#allocation5 + $0x258] sm:$0xff] }
  0x64   :  { %1337 = vmatpush3.bf16.msra.mxu0 %v1336_v33  ;;  %v439_v33 = vld [vmem:[#allocation5 + $0x1c0] sm:$0xff] }
  0x65   :  { %1338 = vmatprep.subr.bf16.mxu0 %v1569_v0  ;;  %v1366_v35 = vpack.c.bf16 %v440_v34, %v439_v33  ;;  %v568_v33 = vld [vmem:[#allocation5 + $0x260] sm:$0xff]  ;;  %v569_v34 = vld [vmem:[#allocation5 + $0x268] sm:$0xff] }
  0x68   :  { %1340 = vmatpush3.bf16.msra.mxu0 %v1339_v36  ;;  %v441_v36 = vld [vmem:[#allocation5 + $0x1d0] sm:$0xff] }
  0x69   :  { %1341 = vmatprep.subr.bf16.mxu0 %v1569_v0  ;;  %v1369_v38 = vpack.c.bf16 %v442_v37, %v441_v36  ;;  %v570_v36 = vld [vmem:[#allocation5 + $0x270] sm:$0xff]  ;;  %v571_v37 = vld [vmem:[#allocation5 + $0x278] sm:$0xff] }
  0x6c   :  { %1343 = vmatpush3.bf16.msra.mxu0 %v1342_v39  ;;  %v443_v39 = vld [vmem:[#allocation5 + $0x1e0] sm:$0xff] }
  0x6d   :  { %1344 = vmatprep.subr.bf16.mxu0 %v1569_v0  ;;  %v1372_v41 = vpack.c.bf16 %v444_v40, %v443_v39 }
  0x70   :  { %1346 = vmatpush3.bf16.msra.mxu0 %v1345_v42  ;;  %v445_v42 = vld [vmem:[#allocation5 + $0x1f0] sm:$0xff] }
  0x71   :  { %1347 = vmatprep.subr.bf16.mxu0 %v1569_v0  ;;  %v1375_v44 = vpack.c.bf16 %v446_v43, %v445_v42 }
  0x74   :  { %1349 = vmatpush3.bf16.msra.mxu0 %v1348_v45 }
  0x75   :  { %1350 = vmatprep.subr.bf16.mxu0 %v1569_v0 }
  0x78   :  { %1352 = vmatpush3.bf16.msra.mxu0 %v1351_v48 }
  0x79   :  { %1377 = vmatprep.subr.bf16.mxu0 %v1569_v0 }
 0x12c   :  { %v141_v51 = vpop.f32.mrb[0].mxu0 }
 0x12d   :  { %v145_v52 = vrot.slane %v141_v51, 4  ;;  %v152_v53 = vmul.f32 %v141_v51, %v141_v51  ;;  %v1070_v54 = vpop.f32.mrb[1].mxu0 }
 0x12f   :  { %v146_v55 = vadd.f32 %v145_v52, %v141_v51  ;;  %v153_v56 = vrot.slane %v152_v53, 4 }
 0x131   :  { %v147_v57 = vrot.slane %v146_v55, 2  ;;  %v154_v58 = vadd.f32 %v153_v56, %v152_v53 }
 0x133   :  { %v148_v59 = vadd.f32 %v147_v57, %v146_v55  ;;  %v155_v60 = vrot.slane %v154_v58, 2 }
 0x135   :  { %v149_v61 = vrot.slane %v148_v59, 1  ;;  %v156_v62 = vadd.f32 %v155_v60, %v154_v58 }
 0x137   :  { %v150_v63 = vadd.f32 %v149_v61, %v148_v59  ;;  %v157_v2 = vrot.slane %v156_v62, 1 }
 0x139   :  { %v151_v3 = vmul.f32 0.125, %v150_v63  ;;  %v158_v4 = vadd.f32 %v157_v2, %v156_v62 }
 0x13b   :  { %v159_v5 = vmul.f32 0.125, %v158_v4  ;;  %v160_v6 = vmul.f32 %v151_v3, %v151_v3 }
 0x13d   :  { %v161_v7 = vsub.f32 %v159_v5, %v160_v6 }
 0x13f   :  { %v162_v8 = vmax.f32 %v161_v7, 0.0 }
 0x141   :  { %v164_v9 = vadd.f32 1e-05, %v162_v8  ;;  %v288_v8 = vld [vmem:[%s1759_s3 + $0x1] sm:$0x1] }
 0x143   :  { %1458 = vrsqrt.f32 %v164_v9 }
 0x14d   :  { %v1459_v14 = vpop.eup %1458 }
 0x14e   :  { %v166_v15 = vmul.f32 %v1459_v14, %v163_v12 }
 0x150   :  { %v168_v17 = vmul.f32 %v166_v15, %v151_v3  ;;  %v173_v18 = vrot.slane %v166_v15, %v1666_v13 }
 0x152   :  { %v169_v19 = vsub.f32 %v167_v16, %v168_v17  ;;  %v174_v20 = vmul.f32 %v173_v18, %v141_v51 }
 0x154   :  { %v178_v21 = vrot.slane %v169_v19, %v1666_v13 }
 0x156   :  { %v179_v22 = vadd.f32 %v178_v21, %v174_v20  ;;  %v431_v21 = vld [vmem:[#allocation5 + $0x180] sm:$0xff] }
 0x158   :  { %vm180_vm1 = vcmp.ge.f32.partialorder %v179_v22, 0.0  ;;  %v181_v23 = vmul.f32 0.2, %v179_v22 }
 0x15a   :  { %v182_v24 = vsel %vm180_vm1, %v179_v22, %v181_v23  ;;  %v432_v22 = vld [vmem:[#allocation5 + $0x188] sm:$0xff] }
 0x15b   :  { %1104 = vmatmul.mubr.f32.vlgmr.msra.gmra.mrb[0].mxu1 %v182_v24  ;;  %v1354_v23 = vpack.c.bf16 %v432_v22, %v431_v21  ;;  %v433_v24 = vld [vmem:[#allocation5 + $0x190] sm:$0xff]  ;;  %v560_v21 = vld [vmem:[#allocation5 + $0x220] sm:$0xff]  ;;  %v561_v22 = vld [vmem:[#allocation5 + $0x228] sm:$0xff] }
 0x15c   :  { %1173 = vmatprep.mubr.msk.f32.mxu1 %vm1570_vm0, %v1571_v1  ;;  %v1357_v26 = vpack.c.bf16 %v434_v25, %v433_v24  ;;  %v562_v24 = vld [vmem:[#allocation5 + $0x230] sm:$0xff]  ;;  %v563_v25 = vld [vmem:[#allocation5 + $0x238] sm:$0xff] }
 0x15d   :  { %1355 = vmatpush3.bf16.msra.mxu1 %v1354_v23  ;;  %v1384_v23 = vpack.c.bf16 %v561_v22, %v560_v21  ;;  %v689_v22 = vld [vmem:[#allocation5 + $0x2c0] sm:$0xff] }
 0x15e   :  { %1356 = vmatprep.subr.bf16.mxu1 %v1569_v0 }
 0x161   :  { %1358 = vmatpush3.bf16.msra.mxu1 %v1357_v26  ;;  %v1387_v26 = vpack.c.bf16 %v563_v25, %v562_v24  ;;  %v691_v25 = vld [vmem:[#allocation5 + $0x2d0] sm:$0xff] }
 0x162   :  { %1359 = vmatprep.subr.bf16.mxu1 %v1569_v0 }
 0x165   :  { %1361 = vmatpush3.bf16.msra.mxu1 %v1360_v29  ;;  %v1390_v29 = vpack.c.bf16 %v565_v28, %v564_v27  ;;  %v693_v28 = vld [vmem:[#allocation5 + $0x2e0] sm:$0xff] }
 0x166   :  { %1362 = vmatprep.subr.bf16.mxu1 %v1569_v0 }
 0x169   :  { %1364 = vmatpush3.bf16.msra.mxu1 %v1363_v32  ;;  %v1393_v32 = vpack.c.bf16 %v567_v31, %v566_v30  ;;  %v695_v31 = vld [vmem:[#allocation5 + $0x2f0] sm:$0xff] }
 0x16a   :  { %1365 = vmatprep.subr.bf16.mxu1 %v1569_v0 }
 0x16d   :  { %1367 = vmatpush3.bf16.msra.mxu1 %v1366_v35  ;;  %v1396_v35 = vpack.c.bf16 %v569_v34, %v568_v33 }
 0x16e   :  { %1368 = vmatprep.subr.bf16.mxu1 %v1569_v0 }
 0x171   :  { %1370 = vmatpush3.bf16.msra.mxu1 %v1369_v38  ;;  %v1399_v38 = vpack.c.bf16 %v571_v37, %v570_v36 }
 0x172   :  { %1371 = vmatprep.subr.bf16.mxu1 %v1569_v0 }
 0x175   :  { %1373 = vmatpush3.bf16.msra.mxu1 %v1372_v41 }
 0x176   :  { %1374 = vmatprep.subr.bf16.mxu1 %v1569_v0 }
 0x179   :  { %1376 = vmatpush3.bf16.msra.mxu1 %v1375_v44 }
 0x17a   :  { %1401 = vmatprep.subr.bf16.mxu1 %v1569_v0 }
 0x22e   :  { %v266_v49 = vpop.f32.mrb[0].mxu1 }
 0x22f   :  { %v270_v50 = vrot.slane %v266_v49, 4  ;;  %v277_v51 = vmul.f32 %v266_v49, %v266_v49  ;;  %v1105_v52 = vpop.f32.mrb[1].mxu1 }
 0x231   :  { %v271_v53 = vadd.f32 %v270_v50, %v266_v49  ;;  %v278_v54 = vrot.slane %v277_v51, 4 }
 0x233   :  { %v272_v55 = vrot.slane %v271_v53, 2  ;;  %v279_v56 = vadd.f32 %v278_v54, %v277_v51 }
 0x235   :  { %v273_v57 = vadd.f32 %v272_v55, %v271_v53  ;;  %v280_v58 = vrot.slane %v279_v56, 2 }
 0x237   :  { %v274_v59 = vrot.slane %v273_v57, 1  ;;  %v281_v60 = vadd.f32 %v280_v58, %v279_v56 }
 0x239   :  { %v275_v61 = vadd.f32 %v274_v59, %v273_v57  ;;  %v282_v62 = vrot.slane %v281_v60, 1 }
 0x23b   :  { %v276_v63 = vmul.f32 0.125, %v275_v61  ;;  %v283_v2 = vadd.f32 %v282_v62, %v281_v60 }
 0x23d   :  { %v284_v3 = vmul.f32 0.125, %v283_v2  ;;  %v285_v4 = vmul.f32 %v276_v63, %v276_v63 }
 0x23f   :  { %v286_v5 = vsub.f32 %v284_v3, %v285_v4  ;;  %v413_v4 = vld [vmem:[%s1759_s3 + $0x2] sm:$0x1] }
 0x241   :  { %v287_v6 = vmax.f32 %v286_v5, 0.0 }
 0x243   :  { %v289_v7 = vadd.f32 1e-05, %v287_v6 }
 0x245   :  { %1460 = vrsqrt.f32 %v289_v7  ;;  %v417_v7 = vld [vmem:[#allocation7 + $0x2] sm:$0x1] }
 0x24f   :  { %v1461_v9 = vpop.eup %1460 }
 0x250   :  { %v291_v10 = vmul.f32 %v1461_v9, %v288_v8 }
 0x252   :  { %v293_v12 = vmul.f32 %v291_v10, %v276_v63  ;;  %v298_v14 = vrot.slane %v291_v10, %v1666_v13 }
 0x254   :  { %v294_v15 = vsub.f32 %v292_v11, %v293_v12  ;;  %v299_v16 = vmul.f32 %v298_v14, %v266_v49 }
 0x256   :  { %v303_v17 = vrot.slane %v294_v15, %v1666_v13  ;;  %v556_v15 = vld [vmem:[#allocation5 + $0x200] sm:$0xff] }
 0x258   :  { %v304_v18 = vadd.f32 %v303_v17, %v299_v16  ;;  %v557_v16 = vld [vmem:[#allocation5 + $0x208] sm:$0xff] }
 0x259   :  { %v1378_v17 = vpack.c.bf16 %v557_v16, %v556_v15  ;;  %v684_v15 = vld [vmem:[#allocation5 + $0x298] sm:$0xff] }
 0x25a   :  { %vm305_vm2 = vcmp.ge.f32.partialorder %v304_v18, 0.0  ;;  %v306_v19 = vmul.f32 0.2, %v304_v18 }
 0x25c   :  { %v307_v20 = vsel %vm305_vm2, %v304_v18, %v306_v19  ;;  %v558_v18 = vld [vmem:[#allocation5 + $0x210] sm:$0xff]  ;;  %v559_v19 = vld [vmem:[#allocation5 + $0x218] sm:$0xff] }
 0x25d   :  { %1139 = vmatmul.mubr.f32.vlgmr.msra.gmra.mrb[2].mxu0 %v307_v20  ;;  %v1381_v20 = vpack.c.bf16 %v559_v19, %v558_v18  ;;  %v686_v18 = vld [vmem:[#allocation5 + $0x2a8] sm:$0xff] }
 0x25e   :  { %1208 = vmatprep.mubr.msk.f32.mxu0 %vm1570_vm0, %v1571_v1  ;;  %1379 = vmatpush3.bf16.msra.mxu0 %v1378_v17  ;;  %v685_v17 = vld [vmem:[#allocation5 + $0x2a0] sm:$0xff] }
 0x25f   :  { %1380 = vmatprep.subr.bf16.mxu0 %v1569_v0  ;;  %v1408_v19 = vpack.c.bf16 %v686_v18, %v685_v17  ;;  %v814_v18 = vld [vmem:[#allocation5 + $0x340] sm:$0xff] }
 0x262   :  { %1382 = vmatpush3.bf16.msra.mxu0 %v1381_v20  ;;  %v687_v20 = vld [vmem:[#allocation5 + $0x2b0] sm:$0xff] }
 0x263   :  { %1383 = vmatprep.subr.bf16.mxu0 %v1569_v0 }
 0x266   :  { %1385 = vmatpush3.bf16.msra.mxu0 %v1384_v23  ;;  %v690_v23 = vld [vmem:[#allocation5 + $0x2c8] sm:$0xff] }
 0x267   :  { %1386 = vmatprep.subr.bf16.mxu0 %v1569_v0  ;;  %v1414_v24 = vpack.c.bf16 %v690_v23, %v689_v22  ;;  %v818_v23 = vld [vmem:[#allocation5 + $0x360] sm:$0xff] }
 0x26a   :  { %1388 = vmatpush3.bf16.msra.mxu0 %v1387_v26  ;;  %v692_v26 = vld [vmem:[#allocation5 + $0x2d8] sm:$0xff] }
 0x26b   :  { %1389 = vmatprep.subr.bf16.mxu0 %v1569_v0  ;;  %v1417_v27 = vpack.c.bf16 %v692_v26, %v691_v25  ;;  %v820_v26 = vld [vmem:[#allocation5 + $0x370] sm:$0xff] }
 0x26e   :  { %1391 = vmatpush3.bf16.msra.mxu0 %v1390_v29  ;;  %v694_v29 = vld [vmem:[#allocation5 + $0x2e8] sm:$0xff] }
 0x26f   :  { %1392 = vmatprep.subr.bf16.mxu0 %v1569_v0  ;;  %v1420_v30 = vpack.c.bf16 %v694_v29, %v693_v28 }
 0x272   :  { %1394 = vmatpush3.bf16.msra.mxu0 %v1393_v32  ;;  %v696_v32 = vld [vmem:[#allocation5 + $0x2f8] sm:$0xff] }
 0x273   :  { %1395 = vmatprep.subr.bf16.mxu0 %v1569_v0  ;;  %v1423_v33 = vpack.c.bf16 %v696_v32, %v695_v31 }
 0x276   :  { %1397 = vmatpush3.bf16.msra.mxu0 %v1396_v35 }
 0x277   :  { %1398 = vmatprep.subr.bf16.mxu0 %v1569_v0 }
 0x27a   :  { %1400 = vmatpush3.bf16.msra.mxu0 %v1399_v38 }
 0x27b   :  { %1425 = vmatprep.subr.bf16.mxu0 %v1569_v0 }
 0x330   :  { %v391_v45 = vpop.f32.mrb[2].mxu0 }
 0x331   :  { %v395_v46 = vrot.slane %v391_v45, 4  ;;  %v402_v47 = vmul.f32 %v391_v45, %v391_v45  ;;  %v1140_v48 = vpop.f32.mrb[3].mxu0 }
 0x333   :  { %v396_v49 = vadd.f32 %v395_v46, %v391_v45  ;;  %v403_v50 = vrot.slane %v402_v47, 4 }
 0x335   :  { %v397_v51 = vrot.slane %v396_v49, 2  ;;  %v404_v52 = vadd.f32 %v403_v50, %v402_v47 }
 0x337   :  { %v398_v53 = vadd.f32 %v397_v51, %v396_v49  ;;  %v405_v54 = vrot.slane %v404_v52, 2 }
 0x339   :  { %v399_v55 = vrot.slane %v398_v53, 1  ;;  %v406_v56 = vadd.f32 %v405_v54, %v404_v52 }
 0x33b   :  { %v400_v57 = vadd.f32 %v399_v55, %v398_v53  ;;  %v407_v58 = vrot.slane %v406_v56, 1 }
 0x33d   :  { %v401_v59 = vmul.f32 0.125, %v400_v57  ;;  %v408_v60 = vadd.f32 %v407_v58, %v406_v56 }
 0x33f   :  { %v409_v61 = vmul.f32 0.125, %v408_v60  ;;  %v410_v62 = vmul.f32 %v401_v59, %v401_v59  ;;  %v535_v60 = vld [vmem:[%s1759_s3 + $0x3] sm:$0x1] }
 0x341   :  { %v411_v63 = vsub.f32 %v409_v61, %v410_v62 }
 0x343   :  { %v412_v2 = vmax.f32 %v411_v63, 0.0  ;;  %v539_v63 = vld [vmem:[#allocation7 + $0x3] sm:$0x1] }
 0x345   :  { %v414_v3 = vadd.f32 1e-05, %v412_v2 }
 0x347   :  { %1462 = vrsqrt.f32 %v414_v3 }
 0x351   :  { %v1463_v5 = vpop.eup %1462 }
 0x352   :  { %v416_v6 = vmul.f32 %v1463_v5, %v413_v4 }
 0x354   :  { %v418_v8 = vmul.f32 %v416_v6, %v401_v59  ;;  %v423_v9 = vrot.slane %v416_v6, %v1666_v13 }
 0x356   :  { %v419_v10 = vsub.f32 %v417_v7, %v418_v8  ;;  %v424_v11 = vmul.f32 %v423_v9, %v391_v45 }
 0x358   :  { %v428_v12 = vrot.slane %v419_v10, %v1666_v13  ;;  %v681_v10 = vld [vmem:[#allocation5 + $0x280] sm:$0xff] }
 0x35a   :  { %v429_v14 = vadd.f32 %v428_v12, %v424_v11  ;;  %v682_v11 = vld [vmem:[#allocation5 + $0x288] sm:$0xff] }
 0x35b   :  { %v1402_v12 = vpack.c.bf16 %v682_v11, %v681_v10  ;;  %v810_v11 = vld [vmem:[#allocation5 + $0x320] sm:$0xff] }
 0x35c   :  { %1174 = vmatmul.mubr.f32.vlgmr.msra.gmra.mrb[2].mxu1 %v429_v14  ;;  %v683_v14 = vld [vmem:[#allocation5 + $0x290] sm:$0xff] }
 0x35d   :  { %1243 = vmatprep.mubr.msk.f32.mxu1 %vm1570_vm0, %v1571_v1  ;;  %1403 = vmatpush3.bf16.msra.mxu1 %v1402_v12  ;;  %v1405_v16 = vpack.c.bf16 %v684_v15, %v683_v14  ;;  %v811_v12 = vld [vmem:[#allocation5 + $0x328] sm:$0xff]  ;;  %v812_v15 = vld [vmem:[#allocation5 + $0x330] sm:$0xff] }
 0x35e   :  { %1404 = vmatprep.subr.bf16.mxu1 %v1569_v0  ;;  %v1432_v14 = vpack.c.bf16 %v811_v12, %v810_v11 }
 0x361   :  { %1406 = vmatpush3.bf16.msra.mxu1 %v1405_v16  ;;  %v813_v16 = vld [vmem:[#allocation5 + $0x338] sm:$0xff] }
 0x362   :  { %1407 = vmatprep.subr.bf16.mxu1 %v1569_v0  ;;  %v1435_v17 = vpack.c.bf16 %v813_v16, %v812_v15 }
 0x365   :  { %1409 = vmatpush3.bf16.msra.mxu1 %v1408_v19  ;;  %v815_v19 = vld [vmem:[#allocation5 + $0x348] sm:$0xff] }
 0x366   :  { %1410 = vmatprep.subr.bf16.mxu1 %v1569_v0 }
 0x42f   :  { %v513_v39 = vpop.f32.mrb[2].mxu1 }
 0x430   :  { %v517_v40 = vrot.slane %v513_v39, 4  ;;  %v524_v41 = vmul.f32 %v513_v39, %v513_v39  ;;  %v1175_v42 = vpop.f32.mrb[3].mxu1 }
 0x432   :  { %v518_v43 = vadd.f32 %v517_v40, %v513_v39  ;;  %v525_v44 = vrot.slane %v524_v41, 4 }
 0x434   :  { %v519_v45 = vrot.slane %v518_v43, 2  ;;  %v526_v46 = vadd.f32 %v525_v44, %v524_v41 }
 0x436   :  { %v520_v47 = vadd.f32 %v519_v45, %v518_v43  ;;  %v527_v48 = vrot.slane %v526_v46, 2 }
 0x438   :  { %v521_v49 = vrot.slane %v520_v47, 1  ;;  %v528_v50 = vadd.f32 %v527_v48, %v526_v46 }
 0x43a   :  { %v522_v51 = vadd.f32 %v521_v49, %v520_v47  ;;  %v529_v52 = vrot.slane %v528_v50, 1 }
 0x43c   :  { %v523_v53 = vmul.f32 0.125, %v522_v51  ;;  %v530_v54 = vadd.f32 %v529_v52, %v528_v50 }
 0x43e   :  { %v531_v55 = vmul.f32 0.125, %v530_v54  ;;  %v532_v56 = vmul.f32 %v523_v53, %v523_v53 }
 0x440   :  { %v533_v57 = vsub.f32 %v531_v55, %v532_v56  ;;  %v660_v55 = vld [vmem:[%s1759_s3 + $0x4] sm:$0x1] }
 0x442   :  { %v534_v58 = vmax.f32 %v533_v57, 0.0 }
 0x444   :  { %v536_v59 = vadd.f32 1e-05, %v534_v58  ;;  %v664_v58 = vld [vmem:[#allocation7 + $0x4] sm:$0x1] }
 0x446   :  { %1464 = vrsqrt.f32 %v536_v59 }
 0x450   :  { %v1465_v61 = vpop.eup %1464 }
 0x451   :  { %v538_v62 = vmul.f32 %v1465_v61, %v535_v60 }
 0x453   :  { %v540_v2 = vmul.f32 %v538_v62, %v523_v53  ;;  %v545_v3 = vrot.slane %v538_v62, %v1666_v13 }
 0x455   :  { %v541_v4 = vsub.f32 %v539_v63, %v540_v2  ;;  %v546_v5 = vmul.f32 %v545_v3, %v513_v39 }
 0x457   :  { %v550_v6 = vrot.slane %v541_v4, %v1666_v13 }
 0x459   :  { %v551_v7 = vadd.f32 %v550_v6, %v546_v5  ;;  %v806_v5 = vld [vmem:[#allocation5 + $0x300] sm:$0xff]  ;;  %v807_v6 = vld [vmem:[#allocation5 + $0x308] sm:$0xff] }
 0x45b   :  { %vm552_vm3 = vcmp.ge.f32.partialorder %v551_v7, 0.0  ;;  %v553_v8 = vmul.f32 0.2, %v551_v7 }
 0x45d   :  { %v554_v9 = vsel %vm552_vm3, %v551_v7, %v553_v8  ;;  %v1426_v7 = vpack.c.bf16 %v807_v6, %v806_v5  ;;  %v808_v8 = vld [vmem:[#allocation5 + $0x310] sm:$0xff] }
 0x45e   :  { %1209 = vmatmul.mubr.f32.vlgmr.msra.gmra.mrb[4].mxu0 %v554_v9  ;;  %v809_v9 = vld [vmem:[#allocation5 + $0x318] sm:$0xff] }
 0x45f   :  { %1278 = vmatprep.mubr.msk.f32.mxu0 %vm1570_vm0, %v1571_v1  ;;  %v688_v1 = vld [vmem:[#allocation5 + $0x2b8] sm:$0xff]  ;;  %1427 = vmatpush3.bf16.msra.mxu0 %v1426_v7  ;;  %v1429_v10 = vpack.c.bf16 %v809_v9, %v808_v8 }
 0x460   :  { %v1411_v21 = vpack.c.bf16 %v688_v1, %v687_v20  ;;  %1428 = vmatprep.subr.bf16.mxu0 %v1569_v0  ;;  %v1438_v20 = vpack.c.bf16 %v815_v19, %v814_v18  ;;  %v816_v1 = vld [vmem:[#allocation5 + $0x350] sm:$0xff] }
 0x462   :  { %1412 = vmatpush3.bf16.msra.mxu1 %v1411_v21  ;;  %v817_v21 = vld [vmem:[#allocation5 + $0x358] sm:$0xff] }
 0x463   :  { %1413 = vmatprep.subr.bf16.mxu1 %v1569_v0  ;;  %1430 = vmatpush3.bf16.msra.mxu0 %v1429_v10  ;;  %v1441_v22 = vpack.c.bf16 %v817_v21, %v816_v1 }
 0x464   :  { %1431 = vmatprep.subr.bf16.mxu0 %v1569_v0 }
 0x466   :  { %1415 = vmatpush3.bf16.msra.mxu1 %v1414_v24  ;;  %v819_v24 = vld [vmem:[#allocation5 + $0x368] sm:$0xff] }
 0x467   :  { %1416 = vmatprep.subr.bf16.mxu1 %v1569_v0  ;;  %1433 = vmatpush3.bf16.msra.mxu0 %v1432_v14  ;;  %v1444_v25 = vpack.c.bf16 %v819_v24, %v818_v23 }
 0x468   :  { %1434 = vmatprep.subr.bf16.mxu0 %v1569_v0 }
 0x46a   :  { %1418 = vmatpush3.bf16.msra.mxu1 %v1417_v27  ;;  %v821_v27 = vld [vmem:[#allocation5 + $0x378] sm:$0xff] }
 0x46b   :  { %1419 = vmatprep.subr.bf16.mxu1 %v1569_v0  ;;  %1436 = vmatpush3.bf16.msra.mxu0 %v1435_v17  ;;  %v1447_v28 = vpack.c.bf16 %v821_v27, %v820_v26 }
 0x46c   :  { %1437 = vmatprep.subr.bf16.mxu0 %v1569_v0 }
 0x46e   :  { %1421 = vmatpush3.bf16.msra.mxu1 %v1420_v30 }
 0x46f   :  { %1422 = vmatprep.subr.bf16.mxu1 %v1569_v0  ;;  %1439 = vmatpush3.bf16.msra.mxu0 %v1438_v20 }
 0x470   :  { %1440 = vmatprep.subr.bf16.mxu0 %v1569_v0 }
 0x472   :  { %1424 = vmatpush3.bf16.msra.mxu1 %v1423_v33 }
 0x473   :  { %1442 = vmatpush3.bf16.msra.mxu0 %v1441_v22 }
 0x474   :  { %1443 = vmatprep.subr.bf16.mxu0 %v1569_v0 }
 0x477   :  { %1445 = vmatpush3.bf16.msra.mxu0 %v1444_v25 }
 0x478   :  { %1446 = vmatprep.subr.bf16.mxu0 %v1569_v0 }
 0x47b   :  { %1448 = vmatpush3.bf16.msra.mxu0 %v1447_v28 }
 0x531   :  { %v638_v34 = vpop.f32.mrb[4].mxu0 }
 0x532   :  { %v642_v35 = vrot.slane %v638_v34, 4  ;;  %v649_v36 = vmul.f32 %v638_v34, %v638_v34  ;;  %v1210_v37 = vpop.f32.mrb[5].mxu0 }
 0x534   :  { %v643_v38 = vadd.f32 %v642_v35, %v638_v34  ;;  %v650_v39 = vrot.slane %v649_v36, 4 }
 0x536   :  { %v644_v40 = vrot.slane %v643_v38, 2  ;;  %v651_v41 = vadd.f32 %v650_v39, %v649_v36 }
 0x538   :  { %v645_v42 = vadd.f32 %v644_v40, %v643_v38  ;;  %v652_v43 = vrot.slane %v651_v41, 2 }
 0x53a   :  { %v646_v44 = vrot.slane %v645_v42, 1  ;;  %v653_v45 = vadd.f32 %v652_v43, %v651_v41 }
 0x53c   :  { %v647_v46 = vadd.f32 %v646_v44, %v645_v42  ;;  %v654_v47 = vrot.slane %v653_v45, 1 }
 0x53e   :  { %v648_v48 = vmul.f32 0.125, %v647_v46  ;;  %v655_v49 = vadd.f32 %v654_v47, %v653_v45 }
 0x540   :  { %v656_v50 = vmul.f32 0.125, %v655_v49  ;;  %v657_v51 = vmul.f32 %v648_v48, %v648_v48  ;;  %v785_v49 = vld [vmem:[%s1759_s3 + $0x5] sm:$0x1]  ;;  %s1572_s3 = smov [#allocation8]  }
 0x541   :  { %s906_s17 = sshll.u32 %s1572_s3, 4  ;;  %s907_s17 = int_to_ptr.vmem [resolvable:$true] %s906_s17 }
 0x542   :  { %v658_v52 = vsub.f32 %v656_v50, %v657_v51  ;;  %s1536_s1 = scalar_lea.vmem %s907_s17, 128  ;;  %p1541_p11 = scmp.lt.s32.totalorder %s907_s17, %s907_s17 }
 0x543   :  { %p1537_p10 = scmp.ne.s32.totalorder %s907_s17, %s1536_s1  ;;  %p1542_p12 = scmp.lt.s32.totalorder %s1536_s1, %s1536_s1 }
 0x544   :  { %v659_v53 = vmax.f32 %v658_v52, 0.0  ;;  %v789_v52 = vld [vmem:[#allocation7 + $0x5] sm:$0x1] }
 0x545   :  { %p1543_p13 = por %p1542_p12, %p1541_p11 }
 0x546   :  { %v661_v54 = vadd.f32 1e-05, %v659_v53 }
 0x547   :  { %p1544_p0 = pnand %p1543_p13, %p1537_p10 }
 0x548   :  { %1466 = vrsqrt.f32 %v661_v54 }
 0x552   :  { %v1467_v56 = vpop.eup %1466 }
 0x553   :  { %v663_v57 = vmul.f32 %v1467_v56, %v660_v55 }
 0x555   :  { %v665_v59 = vmul.f32 %v663_v57, %v648_v48  ;;  %v670_v60 = vrot.slane %v663_v57, %v1666_v13 }
 0x557   :  { %v666_v61 = vsub.f32 %v664_v58, %v665_v59  ;;  %v671_v62 = vmul.f32 %v670_v60, %v638_v34 }
 0x559   :  { %v675_v63 = vrot.slane %v666_v61, %v1666_v13  ;;  %v916_v61 = vld [vmem:[%s1758_s2] ss:$0 sm:$0xff] }
 0x55b   :  { %v676_v2 = vadd.f32 %v675_v63, %v671_v62 }
 0x55d   :  { %vm677_vm4 = vcmp.ge.f32.partialorder %v676_v2, 0.0  ;;  %v678_v3 = vmul.f32 0.2, %v676_v2 }
 0x55f   :  { %v679_v4 = vsel %vm677_vm4, %v676_v2, %v678_v3 }
 0x560   :  { %1244 = vmatmul.mubr.f32.vlgmr.msra.gmra.mrb[4].mxu1 %v679_v4 }
 0x633   :  { %v763_v29 = vpop.f32.mrb[4].mxu1 }
 0x634   :  { %v767_v30 = vrot.slane %v763_v29, 4  ;;  %v774_v31 = vmul.f32 %v763_v29, %v763_v29  ;;  %v1245_v32 = vpop.f32.mrb[5].mxu1 }
 0x636   :  { %v768_v33 = vadd.f32 %v767_v30, %v763_v29  ;;  %v775_v34 = vrot.slane %v774_v31, 4 }
 0x638   :  { %v769_v35 = vrot.slane %v768_v33, 2  ;;  %v776_v36 = vadd.f32 %v775_v34, %v774_v31 }
 0x63a   :  { %v770_v37 = vadd.f32 %v769_v35, %v768_v33  ;;  %v777_v38 = vrot.slane %v776_v36, 2 }
 0x63c   :  { %v771_v39 = vrot.slane %v770_v37, 1  ;;  %v778_v40 = vadd.f32 %v777_v38, %v776_v36 }
 0x63e   :  { %v772_v41 = vadd.f32 %v771_v39, %v770_v37  ;;  %v779_v42 = vrot.slane %v778_v40, 1 }
 0x640   :  { %v773_v43 = vmul.f32 0.125, %v772_v41  ;;  %v780_v0 = vadd.f32 %v779_v42, %v778_v40 }
 0x642   :  { %v781_v44 = vmul.f32 0.125, %v780_v0  ;;  %v782_v45 = vmul.f32 %v773_v43, %v773_v43 }
 0x644   :  { %v783_v46 = vsub.f32 %v781_v44, %v782_v45 }
 0x646   :  { %v784_v47 = vmax.f32 %v783_v46, 0.0 }
 0x648   :  { %v786_v48 = vadd.f32 1e-05, %v784_v47 }
 0x64a   :  { %1468 = vrsqrt.f32 %v786_v48 }
 0x654   :  { %v1469_v50 = vpop.eup %1468 }
 0x655   :  { %v788_v51 = vmul.f32 %v1469_v50, %v785_v49 }
 0x657   :  { %v790_v53 = vmul.f32 %v788_v51, %v773_v43  ;;  %v795_v54 = vrot.slane %v788_v51, %v1666_v13 }
 0x659   :  { %v791_v55 = vsub.f32 %v789_v52, %v790_v53  ;;  %v796_v56 = vmul.f32 %v795_v54, %v763_v29 }
 0x65b   :  { %v800_v57 = vrot.slane %v791_v55, %v1666_v13 }
 0x65d   :  { %v801_v58 = vadd.f32 %v800_v57, %v796_v56 }
 0x65f   :  { %vm802_vm5 = vcmp.ge.f32.partialorder %v801_v58, 0.0  ;;  %v803_v59 = vmul.f32 0.2, %v801_v58 }
 0x661   :  { %v804_v60 = vsel %vm802_vm5, %v801_v58, %v803_v59 }
 0x662   :  { %1279 = vmatmul.mubr.f32.vlgmr.msra.gmra.mrb[6].mxu0 %v804_v60 }
 0x735   :  { %v895_v62 = vpop.f32.mrb[6].mxu0 }
 0x736   :  { %v896_v63 = vadd.f32 %v916_v61, %v895_v62  ;;  %v1280_v2 = vpop.f32.mrb[7].mxu0 }
 0x738   :  { %899 = vst [vmem:[#allocation8] sm:$0xff] %v896_v63 }
 0x739   :  { %1547 = shalt.err (!%p1544_p0)
}
 0x73a   :  { %s1548_s20 = scalar_lea.hbm %s1761_s5, 128 }
 0x73b   :  { %p1549_p1 = scmp.ne.s32.totalorder %s1761_s5, %s1548_s20  ;;  %p1552_p2 = scmp.lt.u32.totalorder %s1548_s20, %s1761_s5 }
 0x73d   :  { %p1554_p3 = pnand %p1552_p2, %p1549_p1 }
 0x73f   :  { %1557 = shalt.err (!%p1554_p3)
}
 0x740   :  { %909 = dma.vmem_to_hbm [thread:$0]  %s907_s17, 128, %s1761_s5, [#allocation4]  }
 0x741   :  { %1562 = dma.done.wait [#allocation4], 128  }
 0x742   :  { %1563 = vsyncadd [#allocation4], 4294967168 }
 0x743   :  { %913 = vsyncpa [#allocation3], 1 }
 0x744   :  { %914 = vsyncpa [#allocation6], 1 }
 0x745   :  { %915 = vsyncpa [#allocation4], 1 }

</bundles_post_ra>
